<compile_context>
chip_gen: v6e
topology: v6e:2x2x1
jax: 0.10.0
libtpu: 0.0.40
codegen_flags: <defaults>
</compile_context>

<pallas_src>
import functools

import jax
import jax.numpy as jnp
from jax.experimental import pallas as pl
from jax.experimental.pallas import tpu as pltpu


# ---------------------------------------------------------------------------
# Kernel
# ---------------------------------------------------------------------------
def _mlp_kernel(x_ref, w1_ref, b1_ref, w2_ref, b2_ref, w3_ref, b3_ref,
                w4_ref, b4_ref, o_ref):
    # Transposed, lane-dense layout (batch along lanes):
    #   x_ref : (1, bn) f32        w1 : (128, 1) f32
    #   b1,b2,b3 : (128, 1)  activation dtype (f32 default, bf16 on v6e/v7x)
    #   w2,w3 : (128, 128) == W^T (out, in), matmul dtype
    #   w4    : (8, 128)   == W4^T zero-padded to 8 sublanes, matmul dtype
    #   b4    : (1, 1) f32         o_ref : (8, bn) f32 (row 0 is the result)
    mm = w2_ref.dtype          # MXU input dtype
    act = b1_ref.dtype         # bias-add / tanh dtype

    x = x_ref[...]                                             # (1, bn) f32

    # Layer 1: Linear(1,128) == outer-product broadcast on the VPU
    # (avoids a K=1 MXU matmul).
    h = jnp.tanh((w1_ref[...] * x).astype(act) + b1_ref[...])  # (128, bn)

    # Layers 2 & 3: (128,128) @ (128,bn) on the MXU, f32 accumulation,
    # bias-add + tanh in the activation dtype.
    h = jnp.tanh(jnp.dot(w2_ref[...], h.astype(mm),
                         preferred_element_type=jnp.float32).astype(act)
                 + b2_ref[...])
    h = jnp.tanh(jnp.dot(w3_ref[...], h.astype(mm),
                         preferred_element_type=jnp.float32).astype(act)
                 + b3_ref[...])

    # Layer 4: (8,128) @ (128,bn) on the (idle) MXU; row 0 is the real w4,
    # rows 1..7 are zero padding.  Store the full dense (8, bn) slab ->
    # unmasked full-vreg stores; the wrapper slices row 0.
    out = jnp.dot(w4_ref[...], h.astype(mm),
                  preferred_element_type=jnp.float32) + b4_ref[...]
    o_ref[...] = out.astype(o_ref.dtype)


# ---------------------------------------------------------------------------
# Helpers
# ---------------------------------------------------------------------------
def _round_up(x, m):
    return -(-x // m) * m


def _choose_tiling(n, block_n, step_overhead_cols=512):
    """Pick (bn, n_pad) for a batch of n columns.

    Cost model (in units of "columns of work"): padded columns run the full
    tanh chain and each grid step costs ~0.35 us of fixed pipeline overhead
    (~step_overhead_cols columns of VPU/EUP work).  Prefer a >=2-step grid
    when it is nearly free so dimension_semantics=("parallel",) can shard the
    batch across v7x's two TensorCores (costless on 1-TC v5e/v6e).
    """
    n128 = _round_up(max(n, 1), 128)
    cands = []
    for bn in range(128, min(block_n, n128) + 1, 128):
        n_pad = _round_up(n128, bn)
        steps = n_pad // bn
        cost = n_pad + step_overhead_cols * steps
        cands.append((cost, -bn, bn, n_pad, steps))
    best = min(cands)
    multi = [c for c in cands if c[4] >= 2]
    if best[4] == 1 and multi:
        best_multi = min(multi)
        if best_multi[0] <= 1.25 * best[0]:   # near-free 2-TC split (v7x)
            best = best_multi
    return best[2], best[3]


def prepare_params(params, matmul_dtype=jnp.float32,
                   activation_dtype=jnp.float32):
    """One-time layout prep (hoisted out of the per-call jit and cached).

    matmul_dtype:     MXU input dtype.  f32 is the safe default; bf16 is the
                      big lever on real v5e/v6e/v7x hardware.
    activation_dtype: bias-add / tanh dtype.  Keep f32 on v5e (no bf16
                      VPU/EUP); bf16 on v6e/v7x halves EUP + intermediate
                      load/store work.
    """
    w1, b1, w2, b2, w3, b3, w4, b4 = params
    w1c = w1.reshape(1, 128).T.astype(jnp.float32)            # (128, 1)
    b1c = b1.reshape(128, 1).astype(activation_dtype)
    w2T = w2.T.astype(matmul_dtype)                           # (128, 128)
    b2c = b2.reshape(128, 1).astype(activation_dtype)
    w3T = w3.T.astype(matmul_dtype)                           # (128, 128)
    b3c = b3.reshape(128, 1).astype(activation_dtype)
    w4T = jnp.zeros((8, 128), jnp.float32).at[0].set(
        w4.reshape(128)).astype(matmul_dtype)                 # (8, 128), row 0 real
    b4c = b4.reshape(1, 1).astype(jnp.float32)
    return (w1c, b1c, w2T, b2c, w3T, b3c, w4T, b4c)


# ---------------------------------------------------------------------------
# Forward pass
# ---------------------------------------------------------------------------
@functools.partial(jax.jit, static_argnames=("block_n",))
def value_function_forward(x, prepped, block_n=2048):
    """Pallas forward of ValueFunction.net. x: (N, 1) f32 -> (N, 1) f32.

    block_n: max batch-tile width (multiple of 128; sweep 1024-4096).
    """
    w1c, b1c, w2T, b2c, w3T, b3c, w4T, b4c = prepped
    N = x.shape[0]

    bn, n_pad = _choose_tiling(N, block_n)

    # Lane-dense: batch maps to lanes.
    xT = jnp.pad(x.reshape(1, N), ((0, 0), (0, n_pad - N)))   # (1, n_pad)

    full = lambda shape: pl.BlockSpec(shape, lambda i: (0, 0))

    mm_item = jnp.dtype(w2T.dtype).itemsize
    act_item = jnp.dtype(b1c.dtype).itemsize

    flops = 2 * n_pad * (128 + 2 * 128 * 128 + 8 * 128)
    transcendentals = 3 * 128 * n_pad
    bytes_accessed = (4 * n_pad + 8 * 4 * n_pad               # x in + dense out
                      + 2 * 128 * 128 * mm_item + 8 * 128 * mm_item
                      + 128 * 4 + 3 * 128 * act_item + 4)

    # VMEM headroom for very large tiles (default scoped limit is 16/32 MiB).
    weight_bytes = 2 * 128 * 128 * mm_item + 8 * 128 * mm_item + 128 * 8
    live_bytes = (4 * 128 * bn * act_item          # ~4 live (128,bn) intermediates
                  + 2 * (1 + 8) * bn * 4           # double-buffered x / out blocks
                  + weight_bytes)
    vmem_limit = None
    if 2 * live_bytes > (24 << 20):
        vmem_limit = int(min(2 * live_bytes, 64 << 20))

    out = pl.pallas_call(
        _mlp_kernel,
        out_shape=jax.ShapeDtypeStruct((8, n_pad), x.dtype),
        grid_spec=pltpu.PrefetchScalarGridSpec(
            num_scalar_prefetch=0,
            grid=(n_pad // bn,),
            in_specs=[
                pl.BlockSpec((1, bn), lambda i: (0, i)),   # x columns (lane-dense)
                full((128, 1)),                            # w1 column
                full((128, 1)),                            # b1
                full((128, 128)),                          # w2^T
                full((128, 1)),                            # b2
                full((128, 128)),                          # w3^T
                full((128, 1)),                            # b3
                full((8, 128)),                            # w4^T (padded rows)
                full((1, 1)),                              # b4
            ],
            out_specs=pl.BlockSpec((8, bn), lambda i: (0, i)),
        ),
        compiler_params=pltpu.CompilerParams(
            dimension_semantics=("parallel",),
            vmem_limit_bytes=vmem_limit),
        cost_estimate=pl.CostEstimate(
            flops=flops,
            transcendentals=transcendentals,
            bytes_accessed=bytes_accessed),
    )(xT, w1c, b1c, w2T, b2c, w3T, b3c, w4T, b4c)

    # Row 0 of the dense (8, n_pad) slab is the real layer-4 output.
    return out[0, :N].reshape(N, 1)


def value_function_forward_mean(x, prepped, block_n=2048):
    """Mirrors the torch np.ndarray branch: scalar mean of net(x)."""
    return jnp.mean(value_function_forward(x, prepped, block_n=block_n))


# ---------------------------------------------------------------------------
# Reference & init
# ---------------------------------------------------------------------------
def init_params(key):
    """Deterministic init matching torch.nn.Linear (U(-1/sqrt(fan_in), +))."""
    ks = jax.random.split(key, 8)

    def linear(kw, kb, fan_in, fan_out):
        bound = 1.0 / jnp.sqrt(fan_in)
        w = jax.random.uniform(kw, (fan_in, fan_out), jnp.float32, -bound, bound)
        b = jax.random.uniform(kb, (fan_out,), jnp.float32, -bound, bound)
        return w, b

    w1, b1 = linear(ks[0], ks[1], 1, 128)
    w2, b2 = linear(ks[2], ks[3], 128, 128)
    w3, b3 = linear(ks[4], ks[5], 128, 128)
    w4, b4 = linear(ks[6], ks[7], 128, 1)
    return (w1, b1, w2, b2, w3, b3, w4, b4)


def reference_forward(x, params):
    w1, b1, w2, b2, w3, b3, w4, b4 = params
    h = jnp.tanh(x @ w1 + b1)
    h = jnp.tanh(h @ w2 + b2)
    h = jnp.tanh(h @ w3 + b3)
    return h @ w4 + b4


# ---------------------------------------------------------------------------
# Main
# ---------------------------------------------------------------------------
if __name__ == "__main__":
    key = jax.random.PRNGKey(0)
    k_param, k_x1, k_x2 = jax.random.split(key, 3)

    params = init_params(k_param)
    # Safe f32 path everywhere (TPU and interpret).  On real v6e/v7x use
    #   prepare_params(params, jnp.bfloat16, jnp.bfloat16)
    # and on v5e prepare_params(params, jnp.bfloat16, jnp.float32).
    prepped = prepare_params(params)

    # Small batch, 1-D input (matches Linear(1, 128)).
    x_small = jax.random.normal(k_x1, (8, 1), dtype=jnp.float32)
    y_ref = reference_forward(x_small, params)
    y = jax.block_until_ready(value_function_forward(x_small, prepped))
    assert y.shape == (8, 1)
    assert jnp.allclose(y, y_ref, atol=1e-4, rtol=1e-4)

    # Non-multiple-of-128 batch exercises padding + tile-selection logic.
    x_mid = jax.random.normal(k_x2, (300, 1), dtype=jnp.float32)
    y2_ref = reference_forward(x_mid, params)
    y2 = jax.block_until_ready(value_function_forward(x_mid, prepped))
    assert y2.shape == (300, 1)
    assert jnp.allclose(y2, y2_ref, atol=1e-4, rtol=1e-4)

    # np.ndarray branch of torch forward(): scalar mean.
    m = jax.block_until_ready(value_function_forward_mean(x_small, prepped))
    assert m.shape == ()

    # TODO(synk): predict_individual(with_gradient=True) needs a backward pass
    # (torch.autograd.grad); only the forward pass is implemented here.
    print("KERNEL_OK")
</pallas_src>

<mosaic_0001>
module attributes {stable_mosaic.version = 11 : i64} {
  func.func @_mlp_kernel(%arg0: i32, %arg1: memref<1x128xf32, #tpu.memory_space<vmem>>, %arg2: memref<128x1xf32, #tpu.memory_space<vmem>>, %arg3: memref<128x1xf32, #tpu.memory_space<vmem>>, %arg4: memref<128x128xf32, #tpu.memory_space<vmem>>, %arg5: memref<128x1xf32, #tpu.memory_space<vmem>>, %arg6: memref<128x128xf32, #tpu.memory_space<vmem>>, %arg7: memref<128x1xf32, #tpu.memory_space<vmem>>, %arg8: memref<8x128xf32, #tpu.memory_space<vmem>>, %arg9: memref<1x1xf32, #tpu.memory_space<vmem>>, %arg10: memref<8x128xf32, #tpu.memory_space<vmem>>) attributes {dimension_semantics = [#tpu.dimension_semantics<parallel>], iteration_bounds = array<i64: 1>, scalar_prefetch = 0 : i64, scratch_operands = 0 : i64, tpu.core_type = #tpu.core_type<tc>, window_params = [{transform_indices = @transform_0, window_bounds = array<i64: 1, 128>}, {pipeline_mode = #tpu.pipeline_mode<synchronous>, transform_indices = @transform_1, window_bounds = array<i64: 128, 1>}, {pipeline_mode = #tpu.pipeline_mode<synchronous>, transform_indices = @transform_2, window_bounds = array<i64: 128, 1>}, {pipeline_mode = #tpu.pipeline_mode<synchronous>, transform_indices = @transform_3, window_bounds = array<i64: 128, 128>}, {pipeline_mode = #tpu.pipeline_mode<synchronous>, transform_indices = @transform_4, window_bounds = array<i64: 128, 1>}, {pipeline_mode = #tpu.pipeline_mode<synchronous>, transform_indices = @transform_5, window_bounds = array<i64: 128, 128>}, {pipeline_mode = #tpu.pipeline_mode<synchronous>, transform_indices = @transform_6, window_bounds = array<i64: 128, 1>}, {pipeline_mode = #tpu.pipeline_mode<synchronous>, transform_indices = @transform_7, window_bounds = array<i64: 8, 128>}, {pipeline_mode = #tpu.pipeline_mode<synchronous>, transform_indices = @transform_8, window_bounds = array<i64: 1, 1>}, {transform_indices = @transform_9, window_bounds = array<i64: 8, 128>}]} {
    %c0 = arith.constant 0 : index
    %c0_0 = arith.constant 0 : index
    %0 = vector.load %arg1[%c0, %c0_0] : memref<1x128xf32, #tpu.memory_space<vmem>>, vector<1x128xf32>
    %c0_1 = arith.constant 0 : index
    %c0_2 = arith.constant 0 : index
    %1 = vector.load %arg2[%c0_1, %c0_2] : memref<128x1xf32, #tpu.memory_space<vmem>>, vector<128x1xf32>
    %2 = vector.broadcast %1 : vector<128x1xf32> to vector<128x128xf32>
    %3 = vector.broadcast %0 : vector<1x128xf32> to vector<128x128xf32>
    %4 = arith.mulf %2, %3 : vector<128x128xf32>
    %c0_3 = arith.constant 0 : index
    %c0_4 = arith.constant 0 : index
    %5 = vector.load %arg3[%c0_3, %c0_4] : memref<128x1xf32, #tpu.memory_space<vmem>>, vector<128x1xf32>
    %6 = vector.broadcast %5 : vector<128x1xf32> to vector<128x128xf32>
    %7 = arith.addf %4, %6 : vector<128x128xf32>
    %8 = math.tanh %7 : vector<128x128xf32>
    %c0_5 = arith.constant 0 : index
    %c0_6 = arith.constant 0 : index
    %9 = vector.load %arg4[%c0_5, %c0_6] : memref<128x128xf32, #tpu.memory_space<vmem>>, vector<128x128xf32>
    %cst = arith.constant dense<0.000000e+00> : vector<128x128xf32>
    %10 = tpu.matmul %9, %8, %cst {dimension_numbers = #tpu.dot_dimension_numbers<[1], [0], [0], [1], [0, 0, 1, 1], [], []>} : vector<128x128xf32>, vector<128x128xf32>, vector<128x128xf32> -> vector<128x128xf32>
    %c0_7 = arith.constant 0 : index
    %c0_8 = arith.constant 0 : index
    %11 = vector.load %arg5[%c0_7, %c0_8] : memref<128x1xf32, #tpu.memory_space<vmem>>, vector<128x1xf32>
    %12 = vector.broadcast %11 : vector<128x1xf32> to vector<128x128xf32>
    %13 = arith.addf %10, %12 : vector<128x128xf32>
    %14 = math.tanh %13 : vector<128x128xf32>
    %c0_9 = arith.constant 0 : index
    %c0_10 = arith.constant 0 : index
    %15 = vector.load %arg6[%c0_9, %c0_10] : memref<128x128xf32, #tpu.memory_space<vmem>>, vector<128x128xf32>
    %cst_11 = arith.constant dense<0.000000e+00> : vector<128x128xf32>
    %16 = tpu.matmul %15, %14, %cst_11 {dimension_numbers = #tpu.dot_dimension_numbers<[1], [0], [0], [1], [0, 0, 1, 1], [], []>} : vector<128x128xf32>, vector<128x128xf32>, vector<128x128xf32> -> vector<128x128xf32>
    %c0_12 = arith.constant 0 : index
    %c0_13 = arith.constant 0 : index
    %17 = vector.load %arg7[%c0_12, %c0_13] : memref<128x1xf32, #tpu.memory_space<vmem>>, vector<128x1xf32>
    %18 = vector.broadcast %17 : vector<128x1xf32> to vector<128x128xf32>
    %19 = arith.addf %16, %18 : vector<128x128xf32>
    %20 = math.tanh %19 : vector<128x128xf32>
    %c0_14 = arith.constant 0 : index
    %c0_15 = arith.constant 0 : index
    %21 = vector.load %arg8[%c0_14, %c0_15] : memref<8x128xf32, #tpu.memory_space<vmem>>, vector<8x128xf32>
    %cst_16 = arith.constant dense<0.000000e+00> : vector<8x128xf32>
    %22 = tpu.matmul %21, %20, %cst_16 {dimension_numbers = #tpu.dot_dimension_numbers<[1], [0], [0], [1], [0, 0, 1, 1], [], []>} : vector<8x128xf32>, vector<128x128xf32>, vector<8x128xf32> -> vector<8x128xf32>
    %c0_17 = arith.constant 0 : index
    %c0_18 = arith.constant 0 : index
    %23 = vector.load %arg9[%c0_17, %c0_18] : memref<1x1xf32, #tpu.memory_space<vmem>>, vector<1x1xf32>
    %24 = vector.broadcast %23 : vector<1x1xf32> to vector<8x128xf32>
    %25 = arith.addf %22, %24 : vector<8x128xf32>
    %c0_19 = arith.constant 0 : index
    %c0_20 = arith.constant 0 : index
    %26 = vector.load %arg10[%c0_19, %c0_20] : memref<8x128xf32, #tpu.memory_space<vmem>>, vector<8x128xf32>
    tpu.vector_store %arg10[%c0_19, %c0_20], %25 {strides = array<i32>} : memref<8x128xf32, #tpu.memory_space<vmem>>, vector<8x128xf32>,
    return
  }
  func.func @transform_0(%arg0: i32) -> (i32, i32) {
    %c0_i32 = arith.constant 0 : i32
    %c0_i32_0 = arith.constant 0 : i32
    return %c0_i32, %arg0 : i32, i32
  }
  func.func @transform_1(%arg0: i32) -> (i32, i32) {
    %c0_i32 = arith.constant 0 : i32
    %c0_i32_0 = arith.constant 0 : i32
    %c0_i32_1 = arith.constant 0 : i32
    return %c0_i32, %c0_i32_0 : i32, i32
  }
  func.func @transform_2(%arg0: i32) -> (i32, i32) {
    %c0_i32 = arith.constant 0 : i32
    %c0_i32_0 = arith.constant 0 : i32
    %c0_i32_1 = arith.constant 0 : i32
    return %c0_i32, %c0_i32_0 : i32, i32
  }
  func.func @transform_3(%arg0: i32) -> (i32, i32) {
    %c0_i32 = arith.constant 0 : i32
    %c0_i32_0 = arith.constant 0 : i32
    %c0_i32_1 = arith.constant 0 : i32
    return %c0_i32, %c0_i32_0 : i32, i32
  }
  func.func @transform_4(%arg0: i32) -> (i32, i32) {
    %c0_i32 = arith.constant 0 : i32
    %c0_i32_0 = arith.constant 0 : i32
    %c0_i32_1 = arith.constant 0 : i32
    return %c0_i32, %c0_i32_0 : i32, i32
  }
  func.func @transform_5(%arg0: i32) -> (i32, i32) {
    %c0_i32 = arith.constant 0 : i32
    %c0_i32_0 = arith.constant 0 : i32
    %c0_i32_1 = arith.constant 0 : i32
    return %c0_i32, %c0_i32_0 : i32, i32
  }
  func.func @transform_6(%arg0: i32) -> (i32, i32) {
    %c0_i32 = arith.constant 0 : i32
    %c0_i32_0 = arith.constant 0 : i32
    %c0_i32_1 = arith.constant 0 : i32
    return %c0_i32, %c0_i32_0 : i32, i32
  }
  func.func @transform_7(%arg0: i32) -> (i32, i32) {
    %c0_i32 = arith.constant 0 : i32
    %c0_i32_0 = arith.constant 0 : i32
    %c0_i32_1 = arith.constant 0 : i32
    return %c0_i32, %c0_i32_0 : i32, i32
  }
  func.func @transform_8(%arg0: i32) -> (i32, i32) {
    %c0_i32 = arith.constant 0 : i32
    %c0_i32_0 = arith.constant 0 : i32
    %c0_i32_1 = arith.constant 0 : i32
    return %c0_i32, %c0_i32_0 : i32, i32
  }
  func.func @transform_9(%arg0: i32) -> (i32, i32) {
    %c0_i32 = arith.constant 0 : i32
    %c0_i32_0 = arith.constant 0 : i32
    return %c0_i32, %arg0 : i32, i32
  }
}

</mosaic_0001>

<bundles_post_ra>
// kernel: value_function_forward.1
= control target key start
LH: loop header
LB: loop body
LE: loop exit
PB: predicated region body
PF: predicated region fallthrough
CT: control target
= control target key end

     0   :  { %v1244_v0 = vmov 0   ;;  %vm1246_vm0 = vmmov 0   ;;  %s1650_s2 = inlined_call_operand.vmem [shape: f32[128,1], index: 2, kind: input, shape index: {}]   ;;  %s1651_s1 = inlined_call_operand.vmem [shape: f32[128,1], index: 1, kind: input, shape index: {}]   ;;  %s1652_s8 = inlined_call_operand.<no memory space> [shape: f32[1,1], index: 8, kind: input, shape index: {}]   ;;  %s1653_s4 = inlined_call_operand.vmem [shape: f32[128,1], index: 4, kind: input, shape index: {}]   ;;  %s1654_s3 = inlined_call_operand.vmem [shape: f32[128,128], index: 3, kind: input, shape index: {}]   ;;  %s1655_s6 = inlined_call_operand.vmem [shape: f32[128,1], index: 6, kind: input, shape index: {}]   ;;  %s1656_s0 = inlined_call_operand.vmem [shape: f32[1,128], index: 0, kind: input, shape index: {}]   ;;  %s1657_s5 = inlined_call_operand.vmem [shape: f32[128,128], index: 5, kind: input, shape index: {}]   ;;  %s1658_s7 = inlined_call_operand.vmem [shape: f32[8,128], index: 7, kind: input, shape index: {}]   ;;  %s1659_s9 = inlined_call_operand.vmem [shape: f32[8,128], index: 9, kind: output, shape index: {}]  }
   0x1   :  { %1147 = vset.pattern.permute.xlu1 %v1244_v0  ;;  %1146 = vset.pattern.permute.xlu0 %v1244_v0  ;;  %v168_v1 = vld [vmem:[%s1650_s2 + $0x78] sm:$0xff]  ;;  %v14_v3 = vstv %s1652_s8  ;;  %v49_v4 = vld [vmem:[%s1651_s1 + $0x70] sm:$0xff]  ;;  %v48_v5 = vld [vmem:[%s1651_s1 + $0x68] sm:$0xff] }
   0x2   :  { %v50_v2 = vld [vmem:[%s1651_s1 + $0x78] sm:$0xff]  ;;  %246 = vperm.xlu1 %1147, %v168_v1   ;;  %15 = vst [vmem:[#allocation2] sm:$0x1] %v14_v3  ;;  %v167_v6 = vld [vmem:[%s1650_s2 + $0x70] sm:$0xff]  ;;  %v47_v7 = vld [vmem:[%s1651_s1 + $0x60] sm:$0xff] }
   0x3   :  { %128 = vperm.xlu0 %1146, %v50_v2   ;;  %v166_v8 = vld [vmem:[%s1650_s2 + $0x68] sm:$0xff]  ;;  %v46_v9 = vld [vmem:[%s1651_s1 + $0x58] sm:$0xff]  ;;  %v165_v10 = vld [vmem:[%s1650_s2 + $0x60] sm:$0xff] }
   0x4   :  { %v45_v11 = vld [vmem:[%s1651_s1 + $0x50] sm:$0xff]  ;;  %v164_v12 = vld [vmem:[%s1650_s2 + $0x58] sm:$0xff]  ;;  %v44_v13 = vld [vmem:[%s1651_s1 + $0x48] sm:$0xff] }
   0x5   :  { %v163_v14 = vld [vmem:[%s1650_s2 + $0x50] sm:$0xff]  ;;  %v43_v15 = vld [vmem:[%s1651_s1 + $0x40] sm:$0xff]  ;;  %v162_v16 = vld [vmem:[%s1650_s2 + $0x48] sm:$0xff] }
   0x6   :  { %118 = vperm.xlu1 %1147, %v48_v5   ;;  %v42_v17 = vld [vmem:[%s1651_s1 + $0x38] sm:$0xff]  ;;  %v161_v18 = vld [vmem:[%s1650_s2 + $0x40] sm:$0xff]  ;;  %v41_v19 = vld [vmem:[%s1651_s1 + $0x30] sm:$0xff] }
   0x7   :  { %123 = vperm.xlu0 %1146, %v49_v4   ;;  %v160_v20 = vld [vmem:[%s1650_s2 + $0x38] sm:$0xff]  ;;  %v40_v21 = vld [vmem:[%s1651_s1 + $0x28] sm:$0xff]  ;;  %v159_v22 = vld [vmem:[%s1650_s2 + $0x30] sm:$0xff] }
   0x8   :  { %v39_v23 = vld [vmem:[%s1651_s1 + $0x20] sm:$0xff]  ;;  %v158_v24 = vld [vmem:[%s1650_s2 + $0x28] sm:$0xff]  ;;  %v38_v25 = vld [vmem:[%s1651_s1 + $0x18] sm:$0xff] }
   0x9   :  { %v157_v26 = vld [vmem:[%s1650_s2 + $0x20] sm:$0xff]  ;;  %v37_v27 = vld [vmem:[%s1651_s1 + $0x10] sm:$0xff]  ;;  %v156_v28 = vld [vmem:[%s1650_s2 + $0x18] sm:$0xff] }
   0xa   :  { %113 = vperm.xlu1 %1147, %v47_v7   ;;  %v36_v29 = vld [vmem:[%s1651_s1 + $0x8] sm:$0xff]  ;;  %v155_v30 = vld [vmem:[%s1650_s2 + $0x10] sm:$0xff]  ;;  %v35_v31 = vld [vmem:[%s1651_s1] sm:$0xff] }
   0xb   :  { %241 = vperm.xlu0 %1146, %v167_v6   ;;  %v154_v32 = vld [vmem:[%s1650_s2 + $0x8] sm:$0xff]  ;;  %v153_v33 = vld [vmem:[%s1650_s2] sm:$0xff]  ;;  %v312_v34 = vld [vmem:[%s1653_s4 + $0x78] sm:$0xff] }
   0xc   :  { %v311_v35 = vld [vmem:[%s1653_s4 + $0x70] sm:$0xff]  ;;  %v310_v36 = vld [vmem:[%s1653_s4 + $0x68] sm:$0xff]  ;;  %v309_v37 = vld [vmem:[%s1653_s4 + $0x60] sm:$0xff] }
   0xd   :  { %v308_v38 = vld [vmem:[%s1653_s4 + $0x58] sm:$0xff]  ;;  %v307_v39 = vld [vmem:[%s1653_s4 + $0x50] sm:$0xff]  ;;  %v306_v40 = vld [vmem:[%s1653_s4 + $0x48] sm:$0xff] }
   0xe   :  { %108 = vperm.xlu1 %1147, %v46_v9   ;;  %v305_v41 = vld [vmem:[%s1653_s4 + $0x40] sm:$0xff]  ;;  %v304_v43 = vld [vmem:[%s1653_s4 + $0x38] sm:$0xff]  ;;  %v303_v44 = vld [vmem:[%s1653_s4 + $0x30] sm:$0xff] }
   0xf   :  { %236 = vperm.xlu0 %1146, %v166_v8   ;;  %v281_v42 = vld [vmem:[%s1654_s3] sm:$0xff]  ;;  %v302_v45 = vld [vmem:[%s1653_s4 + $0x28] sm:$0xff]  ;;  %v300_v47 = vld [vmem:[%s1653_s4 + $0x18] sm:$0xff] }
  0x10   :  { %1028 = vmatprep.mubr.f32.mxu0 %v281_v42  ;;  %v301_v46 = vld [vmem:[%s1653_s4 + $0x20] sm:$0xff]  ;;  %v299_v48 = vld [vmem:[%s1653_s4 + $0x10] sm:$0xff]  ;;  %v298_v49 = vld [vmem:[%s1653_s4 + $0x8] sm:$0xff] }
  0x11   :  { %v297_v50 = vld [vmem:[%s1653_s4] sm:$0xff]  ;;  %v585_v51 = vld [vmem:[%s1655_s6 + $0x78] sm:$0xff]  ;;  %v584_v52 = vld [vmem:[%s1655_s6 + $0x70] sm:$0xff] }
  0x12   :  { %103 = vperm.xlu1 %1147, %v45_v11   ;;  %v583_v53 = vld [vmem:[%s1655_s6 + $0x68] sm:$0xff]  ;;  %v582_v54 = vld [vmem:[%s1655_s6 + $0x60] sm:$0xff]  ;;  %v581_v55 = vld [vmem:[%s1655_s6 + $0x58] sm:$0xff] }
  0x13   :  { %231 = vperm.xlu0 %1146, %v165_v10   ;;  %v580_v56 = vld [vmem:[%s1655_s6 + $0x50] sm:$0xff]  ;;  %v579_v57 = vld [vmem:[%s1655_s6 + $0x48] sm:$0xff]  ;;  %v578_v58 = vld [vmem:[%s1655_s6 + $0x40] sm:$0xff] }
  0x14   :  { %v577_v59 = vld [vmem:[%s1655_s6 + $0x38] sm:$0xff]  ;;  %v576_v60 = vld [vmem:[%s1655_s6 + $0x30] sm:$0xff]  ;;  %v575_v61 = vld [vmem:[%s1655_s6 + $0x28] sm:$0xff] }
  0x15   :  { %v574_v62 = vld [vmem:[%s1655_s6 + $0x20] sm:$0xff]  ;;  %v573_v63 = vld [vmem:[%s1655_s6 + $0x18] sm:$0xff]  ;;  %v572_v0 = vld [vmem:[%s1655_s6 + $0x10] sm:$0xff] }
  0x16   :  { %98 = vperm.xlu1 %1147, %v44_v13   ;;  %v1492_v1 = vld [vmem:[%s1656_s0] ss:$0 sm:$0xff]  ;;  %v571_v2 = vld [vmem:[%s1655_s6 + $0x8] sm:$0xff] }
  0x17   :  { %226 = vperm.xlu0 %1146, %v164_v12   ;;  %v570_v3 = vld [vmem:[%s1655_s6] sm:$0xff] }
  0x18   :  { %v914_v7 = vld [vmem:[#allocation2] ss:$0 sm:$0xff] }
  0x1a   :  { %93 = vperm.xlu1 %1147, %v43_v15  }
  0x1b   :  { %221 = vperm.xlu0 %1146, %v163_v14  }
  0x1e   :  { %88 = vperm.xlu1 %1147, %v42_v17  }
  0x1f   :  { %216 = vperm.xlu0 %1146, %v162_v16  }
  0x22   :  { %83 = vperm.xlu1 %1147, %v41_v19  }
  0x23   :  { %211 = vperm.xlu0 %1146, %v161_v18  }
  0x26   :  { %78 = vperm.xlu1 %1147, %v40_v21  }
  0x27   :  { %206 = vperm.xlu0 %1146, %v160_v20  }
  0x2a   :  { %73 = vperm.xlu1 %1147, %v39_v23  }
  0x2b   :  { %201 = vperm.xlu0 %1146, %v159_v22  }
  0x2e   :  { %68 = vperm.xlu1 %1147, %v38_v25  }
  0x2f   :  { %196 = vperm.xlu0 %1146, %v158_v24  }
  0x32   :  { %63 = vperm.xlu1 %1147, %v37_v27  }
  0x33   :  { %191 = vperm.xlu0 %1146, %v157_v26  }
  0x36   :  { %58 = vperm.xlu1 %1147, %v36_v29  }
  0x37   :  { %186 = vperm.xlu0 %1146, %v156_v28  }
  0x3a   :  { %53 = vperm.xlu1 %1147, %v35_v31  }
  0x3b   :  { %181 = vperm.xlu0 %1146, %v155_v30  }
  0x3e   :  { %171 = vperm.xlu1 %1147, %v153_v33  }
  0x3f   :  { %176 = vperm.xlu0 %1146, %v154_v32  }
  0x42   :  { %385 = vperm.xlu1 %1147, %v311_v35  }
  0x43   :  { %390 = vperm.xlu0 %1146, %v312_v34  }
  0x46   :  { %375 = vperm.xlu1 %1147, %v309_v37  }
  0x47   :  { %380 = vperm.xlu0 %1146, %v310_v36  }
  0x4a   :  { %365 = vperm.xlu1 %1147, %v307_v39  }
  0x4b   :  { %370 = vperm.xlu0 %1146, %v308_v38  }
  0x4e   :  { %355 = vperm.xlu1 %1147, %v305_v41  }
  0x4f   :  { %360 = vperm.xlu0 %1146, %v306_v40  }
  0x52   :  { %345 = vperm.xlu1 %1147, %v303_v44  }
  0x53   :  { %350 = vperm.xlu0 %1146, %v304_v43  }
  0x56   :  { %335 = vperm.xlu1 %1147, %v301_v46  }
  0x57   :  { %340 = vperm.xlu0 %1146, %v302_v45  }
  0x5a   :  { %325 = vperm.xlu1 %1147, %v299_v48  }
  0x5b   :  { %330 = vperm.xlu0 %1146, %v300_v47  }
  0x5e   :  { %315 = vperm.xlu1 %1147, %v297_v50  }
  0x5f   :  { %320 = vperm.xlu0 %1146, %v298_v49  }
  0x62   :  { %658 = vperm.xlu1 %1147, %v584_v52  }
  0x63   :  { %663 = vperm.xlu0 %1146, %v585_v51  }
  0x66   :  { %648 = vperm.xlu1 %1147, %v582_v54  }
  0x67   :  { %653 = vperm.xlu0 %1146, %v583_v53  }
  0x6a   :  { %638 = vperm.xlu1 %1147, %v580_v56  }
  0x6b   :  { %643 = vperm.xlu0 %1146, %v581_v55  }
  0x6e   :  { %628 = vperm.xlu1 %1147, %v578_v58  }
  0x6f   :  { %633 = vperm.xlu0 %1146, %v579_v57  }
  0x72   :  { %618 = vperm.xlu1 %1147, %v576_v60  }
  0x73   :  { %623 = vperm.xlu0 %1146, %v577_v59  }
  0x76   :  { %608 = vperm.xlu1 %1147, %v574_v62  }
  0x77   :  { %613 = vperm.xlu0 %1146, %v575_v61  }
  0x7a   :  { %598 = vperm.xlu1 %1147, %v572_v0  }
  0x7b   :  { %603 = vperm.xlu0 %1146, %v573_v63  }
  0x7d   :  { %v247_v4 = vpop.permute.xlu1 %246 }
  0x7e   :  { %v129_v5 = vpop.permute.xlu0 %128  ;;  %588 = vperm.xlu1 %1147, %v570_v3  }
  0x7f   :  { %v152_v6 = vmul.f32 %v1492_v1, %v129_v5  ;;  %593 = vperm.xlu0 %1146, %v571_v2  }
  0x81   :  { %v264_v8 = vadd.f32 %v247_v4, %v152_v6  ;;  %v119_v10 = vpop.permute.xlu1 %118 }
  0x82   :  { %v124_v9 = vpop.permute.xlu0 %123  ;;  %v150_v15 = vmul.f32 %v1492_v1, %v119_v10 }
  0x83   :  { %1148 = vtanh.f32 %v264_v8  ;;  %835 = vperm.xlu0 %1146, %v914_v7   ;;  %v151_v11 = vmul.f32 %v1492_v1, %v124_v9 }
  0x85   :  { %v114_v13 = vpop.permute.xlu1 %113 }
  0x86   :  { %v242_v12 = vpop.permute.xlu0 %241  ;;  %v149_v19 = vmul.f32 %v1492_v1, %v114_v13 }
  0x87   :  { %v263_v14 = vadd.f32 %v242_v12, %v151_v11 }
  0x89   :  { %1150 = vtanh.f32 %v263_v14  ;;  %v109_v17 = vpop.permute.xlu1 %108 }
  0x8a   :  { %v237_v16 = vpop.permute.xlu0 %236  ;;  %v148_v24 = vmul.f32 %v1492_v1, %v109_v17 }
  0x8b   :  { %v262_v18 = vadd.f32 %v237_v16, %v150_v15 }
  0x8d   :  { %1152 = vtanh.f32 %v262_v18  ;;  %v104_v21 = vpop.permute.xlu1 %103 }
  0x8e   :  { %v232_v20 = vpop.permute.xlu0 %231  ;;  %v147_v28 = vmul.f32 %v1492_v1, %v104_v21  ;;  %v282_v21 = vld [vmem:[%s1654_s3 + $0x8] sm:$0xff] }
  0x8f   :  { %v261_v22 = vadd.f32 %v232_v20, %v149_v19 }
  0x90   :  { %v1149_v23 = vpop.eup %1148 }
  0x91   :  { %1154 = vtanh.f32 %v261_v22  ;;  %996 = vmatprep.subr.mxu0 %v1149_v23  ;;  %v99_v26 = vpop.permute.xlu1 %98  ;;  %v283_v22 = vld [vmem:[%s1654_s3 + $0x10] sm:$0xff] }
  0x92   :  { %v227_v25 = vpop.permute.xlu0 %226  ;;  %997 = vmatpush3.msra.mxu0 %v1149_v23  ;;  %v146_v33 = vmul.f32 %v1492_v1, %v99_v26  ;;  %v284_v23 = vld [vmem:[%s1654_s3 + $0x18] sm:$0xff]  ;;  %v287_v26 = vld [vmem:[%s1654_s3 + $0x30] sm:$0xff] }
  0x93   :  { %v260_v27 = vadd.f32 %v227_v25, %v148_v24  ;;  %v285_v24 = vld [vmem:[%s1654_s3 + $0x20] sm:$0xff]  ;;  %v286_v25 = vld [vmem:[%s1654_s3 + $0x28] sm:$0xff] }
  0x95   :  { %1156 = vtanh.f32 %v260_v27  ;;  %v94_v31 = vpop.permute.xlu1 %93  ;;  %v288_v27 = vld [vmem:[%s1654_s3 + $0x38] sm:$0xff] }
  0x96   :  { %v1151_v29 = vpop.eup %1150  ;;  %v222_v30 = vpop.permute.xlu0 %221  ;;  %v145_v38 = vmul.f32 %v1492_v1, %v94_v31  ;;  %v292_v31 = vld [vmem:[%s1654_s3 + $0x58] sm:$0xff] }
  0x97   :  { %v259_v32 = vadd.f32 %v222_v30, %v147_v28  ;;  %998 = vmatprep.subr.mxu0 %v1151_v29  ;;  %v289_v28 = vld [vmem:[%s1654_s3 + $0x40] sm:$0xff]  ;;  %v291_v30 = vld [vmem:[%s1654_s3 + $0x50] sm:$0xff] }
  0x98   :  { %999 = vmatpush3.msra.mxu0 %v1151_v29  ;;  %v290_v29 = vld [vmem:[%s1654_s3 + $0x48] sm:$0xff] }
  0x99   :  { %1158 = vtanh.f32 %v259_v32  ;;  %v89_v36 = vpop.permute.xlu1 %88  ;;  %v293_v32 = vld [vmem:[%s1654_s3 + $0x60] sm:$0xff] }
  0x9a   :  { %v1153_v34 = vpop.eup %1152  ;;  %v217_v35 = vpop.permute.xlu0 %216  ;;  %v144_v43 = vmul.f32 %v1492_v1, %v89_v36  ;;  %v554_v36 = vld [vmem:[%s1657_s5] sm:$0xff] }
  0x9b   :  { %v258_v37 = vadd.f32 %v217_v35, %v146_v33  ;;  %1000 = vmatprep.subr.mxu0 %v1153_v34  ;;  %v294_v33 = vld [vmem:[%s1654_s3 + $0x68] sm:$0xff]  ;;  %v296_v35 = vld [vmem:[%s1654_s3 + $0x78] sm:$0xff]  ;;  %1084 = vmatprep.mubr.f32.mxu1 %v554_v36 }
  0x9c   :  { %1001 = vmatpush3.msra.mxu0 %v1153_v34  ;;  %v295_v34 = vld [vmem:[%s1654_s3 + $0x70] sm:$0xff] }
  0x9d   :  { %1160 = vtanh.f32 %v258_v37  ;;  %v84_v41 = vpop.permute.xlu1 %83 }
  0x9e   :  { %v1155_v39 = vpop.eup %1154  ;;  %v212_v40 = vpop.permute.xlu0 %211  ;;  %v143_v48 = vmul.f32 %v1492_v1, %v84_v41 }
  0x9f   :  { %v257_v42 = vadd.f32 %v212_v40, %v145_v38  ;;  %1002 = vmatprep.subr.mxu0 %v1155_v39 }
  0xa0   :  { %1003 = vmatpush3.msra.mxu0 %v1155_v39 }
  0xa1   :  { %1162 = vtanh.f32 %v257_v42  ;;  %v79_v46 = vpop.permute.xlu1 %78 }
  0xa2   :  { %v1157_v44 = vpop.eup %1156  ;;  %v207_v45 = vpop.permute.xlu0 %206  ;;  %v142_v53 = vmul.f32 %v1492_v1, %v79_v46 }
  0xa3   :  { %v256_v47 = vadd.f32 %v207_v45, %v144_v43  ;;  %1004 = vmatprep.subr.mxu0 %v1157_v44 }
  0xa4   :  { %1005 = vmatpush3.msra.mxu0 %v1157_v44 }
  0xa5   :  { %1164 = vtanh.f32 %v256_v47  ;;  %v74_v51 = vpop.permute.xlu1 %73 }
  0xa6   :  { %v1159_v49 = vpop.eup %1158  ;;  %v202_v50 = vpop.permute.xlu0 %201  ;;  %v141_v58 = vmul.f32 %v1492_v1, %v74_v51 }
  0xa7   :  { %v255_v52 = vadd.f32 %v202_v50, %v143_v48  ;;  %1006 = vmatprep.subr.mxu0 %v1159_v49 }
  0xa8   :  { %1007 = vmatpush3.msra.mxu0 %v1159_v49 }
  0xa9   :  { %1166 = vtanh.f32 %v255_v52  ;;  %v69_v56 = vpop.permute.xlu1 %68 }
  0xaa   :  { %v1161_v54 = vpop.eup %1160  ;;  %v197_v55 = vpop.permute.xlu0 %196  ;;  %v140_v63 = vmul.f32 %v1492_v1, %v69_v56 }
  0xab   :  { %v254_v57 = vadd.f32 %v197_v55, %v142_v53  ;;  %1008 = vmatprep.subr.mxu0 %v1161_v54 }
  0xac   :  { %1009 = vmatpush3.msra.mxu0 %v1161_v54 }
  0xad   :  { %1168 = vtanh.f32 %v254_v57  ;;  %v64_v61 = vpop.permute.xlu1 %63 }
  0xae   :  { %v1163_v59 = vpop.eup %1162  ;;  %v192_v60 = vpop.permute.xlu0 %191  ;;  %v139_v5 = vmul.f32 %v1492_v1, %v64_v61 }
  0xaf   :  { %v253_v62 = vadd.f32 %v192_v60, %v141_v58  ;;  %1010 = vmatprep.subr.mxu0 %v1163_v59 }
  0xb0   :  { %1011 = vmatpush3.msra.mxu0 %v1163_v59 }
  0xb1   :  { %1170 = vtanh.f32 %v253_v62  ;;  %v59_v3 = vpop.permute.xlu1 %58 }
  0xb2   :  { %v1165_v0 = vpop.eup %1164  ;;  %v187_v2 = vpop.permute.xlu0 %186  ;;  %v138_v10 = vmul.f32 %v1492_v1, %v59_v3 }
  0xb3   :  { %v252_v4 = vadd.f32 %v187_v2, %v140_v63  ;;  %1012 = vmatprep.subr.mxu0 %v1165_v0 }
  0xb4   :  { %1013 = vmatpush3.msra.mxu0 %v1165_v0 }
  0xb5   :  { %1172 = vtanh.f32 %v252_v4  ;;  %v54_v8 = vpop.permute.xlu1 %53 }
  0xb6   :  { %v1167_v6 = vpop.eup %1166  ;;  %v182_v7 = vpop.permute.xlu0 %181  ;;  %v137_v11 = vmul.f32 %v1492_v1, %v54_v8 }
  0xb7   :  { %v251_v9 = vadd.f32 %v182_v7, %v139_v5  ;;  %1014 = vmatprep.subr.mxu0 %v1167_v6 }
  0xb8   :  { %1015 = vmatpush3.msra.mxu0 %v1167_v6 }
  0xb9   :  { %1174 = vtanh.f32 %v251_v9  ;;  %v172_v14 = vpop.permute.xlu1 %171 }
  0xba   :  { %v1169_v12 = vpop.eup %1168  ;;  %v177_v13 = vpop.permute.xlu0 %176  ;;  %v249_v16 = vadd.f32 %v172_v14, %v137_v11 }
  0xbb   :  { %v250_v15 = vadd.f32 %v177_v13, %v138_v10  ;;  %1016 = vmatprep.subr.mxu0 %v1169_v12 }
  0xbc   :  { %1017 = vmatpush3.msra.mxu0 %v1169_v12 }
  0xbd   :  { %1176 = vtanh.f32 %v250_v15  ;;  %v386_v45 = vpop.permute.xlu1 %385 }
  0xbe   :  { %v1171_v17 = vpop.eup %1170  ;;  %1178 = vtanh.f32 %v249_v16  ;;  %v391_v43 = vpop.permute.xlu0 %390 }
  0xbf   :  { %1018 = vmatprep.subr.mxu0 %v1171_v17 }
  0xc0   :  { %1019 = vmatpush3.msra.mxu0 %v1171_v17 }
  0xc1   :  { %v376_v50 = vpop.permute.xlu1 %375 }
  0xc2   :  { %v1173_v18 = vpop.eup %1172  ;;  %v381_v48 = vpop.permute.xlu0 %380 }
  0xc3   :  { %1020 = vmatprep.subr.mxu0 %v1173_v18 }
  0xc4   :  { %1021 = vmatpush3.msra.mxu0 %v1173_v18 }
  0xc5   :  { %v366_v55 = vpop.permute.xlu1 %365 }
  0xc6   :  { %v1175_v19 = vpop.eup %1174  ;;  %v371_v53 = vpop.permute.xlu0 %370 }
  0xc7   :  { %1022 = vmatprep.subr.mxu0 %v1175_v19 }
  0xc8   :  { %1023 = vmatpush3.msra.mxu0 %v1175_v19 }
  0xc9   :  { %v356_v63 = vpop.permute.xlu1 %355 }
  0xca   :  { %v1177_v20 = vpop.eup %1176  ;;  %v361_v59 = vpop.permute.xlu0 %360 }
  0xcb   :  { %1024 = vmatprep.subr.mxu0 %v1177_v20  ;;  %v1179_v1 = vpop.eup %1178 }
  0xcc   :  { %1025 = vmatpush3.msra.mxu0 %v1177_v20 }
  0xcd   :  { %1026 = vmatprep.subr.mxu0 %v1179_v1  ;;  %v346_v5 = vpop.permute.xlu1 %345 }
  0xce   :  { %1027 = vmatpush3.msra.mxu0 %v1179_v1  ;;  %v351_v3 = vpop.permute.xlu0 %350 }
  0xcf   :  { %1029 = vmatmul.mubr.f32.vlgmr.msra.gmra.mxu0 %v282_v21 }
  0xd0   :  { %1031 = vmatprep.mubr.f32.mxu0 %v283_v22 }
  0xd1   :  { %v336_v11 = vpop.permute.xlu1 %335 }
  0xd2   :  { %v341_v8 = vpop.permute.xlu0 %340 }
  0xd3   :  { %1032 = vmatmul.mubr.f32.gmra.mxu0 %v284_v23 }
  0xd4   :  { %1034 = vmatprep.mubr.f32.mxu0 %v285_v24 }
  0xd5   :  { %v326_v19 = vpop.permute.xlu1 %325 }
  0xd6   :  { %v331_v16 = vpop.permute.xlu0 %330 }
  0xd7   :  { %1035 = vmatmul.mubr.f32.gmra.mxu0 %v286_v25 }
  0xd8   :  { %1037 = vmatprep.mubr.f32.mxu0 %v287_v26 }
  0xd9   :  { %v316_v26 = vpop.permute.xlu1 %315 }
  0xda   :  { %v321_v23 = vpop.permute.xlu0 %320 }
  0xdb   :  { %1038 = vmatmul.mubr.f32.gmra.mxu0 %v288_v27 }
  0xdc   :  { %1040 = vmatprep.mubr.f32.mxu0 %v289_v28 }
  0xdf   :  { %1041 = vmatmul.mubr.f32.gmra.mxu0 %v290_v29 }
  0xe0   :  { %1043 = vmatprep.mubr.f32.mxu0 %v291_v30 }
  0xe3   :  { %1044 = vmatmul.mubr.f32.gmra.mxu0 %v292_v31 }
  0xe4   :  { %1046 = vmatprep.mubr.f32.mxu0 %v293_v32 }
  0xe7   :  { %1047 = vmatmul.mubr.f32.gmra.mxu0 %v294_v33 }
  0xe8   :  { %1049 = vmatprep.mubr.f32.mxu0 %v295_v34 }
  0xeb   :  { %1050 = vmatmul.mubr.f32.gmra.mxu0 %v296_v35 }
 0x18f   :  { %v1564_v37 = vpop.f32.mrf.mxu0 }
 0x190   :  { %v465_v24 = vadd.f32 %v1564_v37, %v321_v23  ;;  %v555_v37 = vld [vmem:[%s1657_s5 + $0x8] sm:$0xff] }
 0x191   :  { %v1566_v38 = vpop.f32.mrf.mxu0 }
 0x192   :  { %v460_v27 = vadd.f32 %v1566_v38, %v316_v26  ;;  %v556_v38 = vld [vmem:[%s1657_s5 + $0x10] sm:$0xff] }
 0x193   :  { %v1033_v39 = vpop.f32.mrf.mxu0 }
 0x194   :  { %v475_v20 = vadd.f32 %v1033_v39, %v331_v16  ;;  %v557_v39 = vld [vmem:[%s1657_s5 + $0x18] sm:$0xff] }
 0x195   :  { %v1568_v40 = vpop.f32.mrf.mxu0 }
 0x196   :  { %v470_v21 = vadd.f32 %v1568_v40, %v326_v19  ;;  %v558_v40 = vld [vmem:[%s1657_s5 + $0x20] sm:$0xff] }
 0x197   :  { %v1036_v41 = vpop.f32.mrf.mxu0 }
 0x198   :  { %v485_v14 = vadd.f32 %v1036_v41, %v341_v8  ;;  %v559_v41 = vld [vmem:[%s1657_s5 + $0x28] sm:$0xff] }
 0x199   :  { %v479_v42 = vpop.f32.mrf.mxu0 }
 0x19a   :  { %v480_v17 = vadd.f32 %v479_v42, %v336_v11  ;;  %v560_v42 = vld [vmem:[%s1657_s5 + $0x30] sm:$0xff] }
 0x19b   :  { %v1039_v44 = vpop.f32.mrf.mxu0 }
 0x19c   :  { %v495_v9 = vadd.f32 %v1039_v44, %v351_v3  ;;  %v562_v44 = vld [vmem:[%s1657_s5 + $0x40] sm:$0xff] }
 0x19d   :  { %v489_v46 = vpop.f32.mrf.mxu0 }
 0x19e   :  { %v490_v12 = vadd.f32 %v489_v46, %v346_v5  ;;  %v564_v46 = vld [vmem:[%s1657_s5 + $0x50] sm:$0xff] }
 0x19f   :  { %v1042_v47 = vpop.f32.mrf.mxu0 }
 0x1a0   :  { %v505_v6 = vadd.f32 %v1042_v47, %v361_v59  ;;  %v565_v47 = vld [vmem:[%s1657_s5 + $0x58] sm:$0xff]  ;;  %v664_v59 = vpop.permute.xlu0 %663 }
 0x1a1   :  { %v499_v49 = vpop.f32.mrf.mxu0 }
 0x1a2   :  { %v500_v7 = vadd.f32 %v499_v49, %v356_v63  ;;  %v567_v49 = vld [vmem:[%s1657_s5 + $0x68] sm:$0xff] }
 0x1a3   :  { %v1045_v51 = vpop.f32.mrf.mxu0 }
 0x1a4   :  { %v515_v2 = vadd.f32 %v1045_v51, %v371_v53  ;;  %v569_v51 = vld [vmem:[%s1657_s5 + $0x78] sm:$0xff] }
 0x1a5   :  { %v509_v52 = vpop.f32.mrf.mxu0 }
 0x1a6   :  { %v510_v4 = vadd.f32 %v509_v52, %v366_v55  ;;  %v1245_v52 = vmov 0.0  }
 0x1a7   :  { %v1048_v54 = vpop.f32.mrf.mxu0  ;;  %1108 = vmatprep.subr.mxu0 %v1245_v52  ;;  %1140 = vmatprep.mubr.msk.f32.mxu0 %vm1246_vm0, %v1245_v52 }
 0x1a8   :  { %v525_v61 = vadd.f32 %v1048_v54, %v381_v48  ;;  %v566_v48 = vld [vmem:[%s1657_s5 + $0x60] sm:$0xff] }
 0x1a9   :  { %v519_v56 = vpop.f32.mrf.mxu0 }
 0x1aa   :  { %v520_v0 = vadd.f32 %v519_v56, %v376_v50  ;;  %v568_v50 = vld [vmem:[%s1657_s5 + $0x70] sm:$0xff] }
 0x1ab   :  { %v1051_v57 = vpop.f32.mrf.mxu0 }
 0x1ac   :  { %v535_v58 = vadd.f32 %v1051_v57, %v391_v43  ;;  %v561_v43 = vld [vmem:[%s1657_s5 + $0x38] sm:$0xff] }
 0x1ad   :  { %v529_v60 = vpop.f32.mrf.mxu0 }
 0x1ae   :  { %1180 = vtanh.f32 %v535_v58  ;;  %v530_v62 = vadd.f32 %v529_v60, %v386_v45  ;;  %v563_v45 = vld [vmem:[%s1657_s5 + $0x48] sm:$0xff] }
 0x1b0   :  { %1182 = vtanh.f32 %v530_v62 }
 0x1b1   :  { %1184 = vtanh.f32 %v525_v61  ;;  %v659_v61 = vpop.permute.xlu1 %658 }
 0x1b2   :  { %1186 = vtanh.f32 %v520_v0  ;;  %v654_v0 = vpop.permute.xlu0 %653 }
 0x1b3   :  { %1188 = vtanh.f32 %v515_v2 }
 0x1b4   :  { %1190 = vtanh.f32 %v510_v4 }
 0x1b5   :  { %1192 = vtanh.f32 %v505_v6  ;;  %v649_v3 = vpop.permute.xlu1 %648 }
 0x1b6   :  { %1194 = vtanh.f32 %v500_v7  ;;  %v644_v6 = vpop.permute.xlu0 %643 }
 0x1b7   :  { %1196 = vtanh.f32 %v495_v9 }
 0x1b8   :  { %1198 = vtanh.f32 %v490_v12 }
 0x1b9   :  { %1200 = vtanh.f32 %v485_v14  ;;  %v639_v8 = vpop.permute.xlu1 %638 }
 0x1ba   :  { %1202 = vtanh.f32 %v480_v17  ;;  %v634_v12 = vpop.permute.xlu0 %633 }
 0x1bb   :  { %v1181_v10 = vpop.eup %1180  ;;  %1204 = vtanh.f32 %v475_v20 }
 0x1bc   :  { %1052 = vmatprep.subr.mxu1 %v1181_v10  ;;  %1206 = vtanh.f32 %v470_v21 }
 0x1bd   :  { %v1183_v13 = vpop.eup %1182  ;;  %1053 = vmatpush3.msra.mxu1 %v1181_v10  ;;  %1208 = vtanh.f32 %v465_v24  ;;  %v629_v16 = vpop.permute.xlu1 %628 }
 0x1be   :  { %1054 = vmatprep.subr.mxu1 %v1183_v13  ;;  %v1185_v15 = vpop.eup %1184  ;;  %1210 = vtanh.f32 %v460_v27  ;;  %v624_v19 = vpop.permute.xlu0 %623 }
 0x1bf   :  { %1055 = vmatpush3.msra.mxu1 %v1183_v13  ;;  %v1187_v18 = vpop.eup %1186 }
 0x1c0   :  { %1056 = vmatprep.subr.mxu1 %v1185_v15  ;;  %v1189_v1 = vpop.eup %1188 }
 0x1c1   :  { %1057 = vmatpush3.msra.mxu1 %v1185_v15  ;;  %v1191_v22 = vpop.eup %1190 }
 0x1c2   :  { %1058 = vmatprep.subr.mxu1 %v1187_v18  ;;  %v1193_v25 = vpop.eup %1192  ;;  %v614_v23 = vpop.permute.xlu0 %613 }
 0x1c3   :  { %1059 = vmatpush3.msra.mxu1 %v1187_v18  ;;  %v1195_v28 = vpop.eup %1194 }
 0x1c4   :  { %1060 = vmatprep.subr.mxu1 %v1189_v1  ;;  %v1197_v29 = vpop.eup %1196 }
 0x1c5   :  { %1061 = vmatpush3.msra.mxu1 %v1189_v1  ;;  %v1199_v30 = vpop.eup %1198  ;;  %v619_v1 = vpop.permute.xlu1 %618 }
 0x1c6   :  { %1062 = vmatprep.subr.mxu1 %v1191_v22  ;;  %v1201_v31 = vpop.eup %1200 }
 0x1c7   :  { %1063 = vmatpush3.msra.mxu1 %v1191_v22  ;;  %v1203_v32 = vpop.eup %1202 }
 0x1c8   :  { %1064 = vmatprep.subr.mxu1 %v1193_v25  ;;  %v1205_v33 = vpop.eup %1204 }
 0x1c9   :  { %1065 = vmatpush3.msra.mxu1 %v1193_v25  ;;  %v1207_v34 = vpop.eup %1206  ;;  %v609_v26 = vpop.permute.xlu1 %608 }
 0x1ca   :  { %1066 = vmatprep.subr.mxu1 %v1195_v28  ;;  %v1209_v35 = vpop.eup %1208 }
 0x1cb   :  { %1067 = vmatpush3.msra.mxu1 %v1195_v28  ;;  %v1211_v36 = vpop.eup %1210 }
 0x1cc   :  { %1068 = vmatprep.subr.mxu1 %v1197_v29 }
 0x1cd   :  { %1069 = vmatpush3.msra.mxu1 %v1197_v29 }
 0x1ce   :  { %1070 = vmatprep.subr.mxu1 %v1199_v30 }
 0x1cf   :  { %1071 = vmatpush3.msra.mxu1 %v1199_v30 }
 0x1d0   :  { %1072 = vmatprep.subr.mxu1 %v1201_v31 }
 0x1d1   :  { %1073 = vmatpush3.msra.mxu1 %v1201_v31  ;;  %v604_v31 = vpop.permute.xlu0 %603 }
 0x1d2   :  { %1074 = vmatprep.subr.mxu1 %v1203_v32 }
 0x1d3   :  { %1075 = vmatpush3.msra.mxu1 %v1203_v32 }
 0x1d4   :  { %1076 = vmatprep.subr.mxu1 %v1205_v33 }
 0x1d5   :  { %1077 = vmatpush3.msra.mxu1 %v1205_v33 }
 0x1d6   :  { %1078 = vmatprep.subr.mxu1 %v1207_v34 }
 0x1d7   :  { %1079 = vmatpush3.msra.mxu1 %v1207_v34  ;;  %v599_v34 = vpop.permute.xlu1 %598 }
 0x1d8   :  { %1080 = vmatprep.subr.mxu1 %v1209_v35 }
 0x1d9   :  { %1081 = vmatpush3.msra.mxu1 %v1209_v35 }
 0x1da   :  { %1082 = vmatprep.subr.mxu1 %v1211_v36 }
 0x1db   :  { %1083 = vmatpush3.msra.mxu1 %v1211_v36 }
 0x1dc   :  { %1085 = vmatmul.mubr.f32.vlgmr.msra.gmra.mxu1 %v555_v37 }
 0x1dd   :  { %1087 = vmatprep.mubr.f32.mxu1 %v556_v38 }
 0x1e0   :  { %1088 = vmatmul.mubr.f32.gmra.mxu1 %v557_v39  ;;  %v594_v39 = vpop.permute.xlu0 %593 }
 0x1e1   :  { %1090 = vmatprep.mubr.f32.mxu1 %v558_v40 }
 0x1e4   :  { %1091 = vmatmul.mubr.f32.gmra.mxu1 %v559_v41 }
 0x1e5   :  { %1093 = vmatprep.mubr.f32.mxu1 %v560_v42  ;;  %v589_v42 = vpop.permute.xlu1 %588 }
 0x1e8   :  { %1094 = vmatmul.mubr.f32.gmra.mxu1 %v561_v43 }
 0x1e9   :  { %1096 = vmatprep.mubr.f32.mxu1 %v562_v44 }
 0x1ec   :  { %1097 = vmatmul.mubr.f32.gmra.mxu1 %v563_v45 }
 0x1ed   :  { %1099 = vmatprep.mubr.f32.mxu1 %v564_v46 }
 0x1f0   :  { %1100 = vmatmul.mubr.f32.gmra.mxu1 %v565_v47 }
 0x1f1   :  { %1102 = vmatprep.mubr.f32.mxu1 %v566_v48 }
 0x1f4   :  { %1103 = vmatmul.mubr.f32.gmra.mxu1 %v567_v49 }
 0x1f5   :  { %1105 = vmatprep.mubr.f32.mxu1 %v568_v50 }
 0x1f8   :  { %1106 = vmatmul.mubr.f32.gmra.mxu1 %v569_v51 }
 0x29c   :  { %v1620_v53 = vpop.f32.mrf.mxu1 }
 0x29d   :  { %v738_v40 = vadd.f32 %v1620_v53, %v594_v39  ;;  %v827_v53 = vld [vmem:[%s1658_s7] sm:$0xff] }
 0x29e   :  { %v1622_v54 = vpop.f32.mrf.mxu1 }
 0x29f   :  { %v733_v43 = vadd.f32 %v1622_v54, %v589_v42 }
 0x2a0   :  { %v1089_v55 = vpop.f32.mrf.mxu1 }
 0x2a1   :  { %v748_v35 = vadd.f32 %v1089_v55, %v604_v31  ;;  %v836_v55 = vpop.permute.xlu0 %835 }
 0x2a2   :  { %v1624_v56 = vpop.f32.mrf.mxu1 }
 0x2a3   :  { %v743_v37 = vadd.f32 %v1624_v56, %v599_v34 }
 0x2a4   :  { %v1092_v57 = vpop.f32.mrf.mxu1 }
 0x2a5   :  { %v758_v29 = vadd.f32 %v1092_v57, %v614_v23 }
 0x2a6   :  { %v752_v58 = vpop.f32.mrf.mxu1 }
 0x2a7   :  { %v753_v32 = vadd.f32 %v752_v58, %v609_v26 }
 0x2a8   :  { %v1095_v60 = vpop.f32.mrf.mxu1 }
 0x2a9   :  { %v768_v24 = vadd.f32 %v1095_v60, %v624_v19 }
 0x2aa   :  { %v762_v62 = vpop.f32.mrf.mxu1 }
 0x2ab   :  { %v763_v27 = vadd.f32 %v762_v62, %v619_v1 }
 0x2ac   :  { %v1098_v63 = vpop.f32.mrf.mxu1 }
 0x2ad   :  { %v778_v21 = vadd.f32 %v1098_v63, %v634_v12 }
 0x2ae   :  { %v772_v2 = vpop.f32.mrf.mxu1 }
 0x2af   :  { %v773_v22 = vadd.f32 %v772_v2, %v629_v16 }
 0x2b0   :  { %v1101_v4 = vpop.f32.mrf.mxu1 }
 0x2b1   :  { %v788_v18 = vadd.f32 %v1101_v4, %v644_v6 }
 0x2b2   :  { %v782_v5 = vpop.f32.mrf.mxu1 }
 0x2b3   :  { %v783_v20 = vadd.f32 %v782_v5, %v639_v8 }
 0x2b4   :  { %v1104_v7 = vpop.f32.mrf.mxu1 }
 0x2b5   :  { %v798_v14 = vadd.f32 %v1104_v7, %v654_v0 }
 0x2b6   :  { %v792_v9 = vpop.f32.mrf.mxu1 }
 0x2b7   :  { %v793_v17 = vadd.f32 %v792_v9, %v649_v3 }
 0x2b8   :  { %v1107_v10 = vpop.f32.mrf.mxu1 }
 0x2b9   :  { %v808_v11 = vadd.f32 %v1107_v10, %v664_v59 }
 0x2ba   :  { %v802_v13 = vpop.f32.mrf.mxu1 }
 0x2bb   :  { %1212 = vtanh.f32 %v808_v11  ;;  %v803_v15 = vadd.f32 %v802_v13, %v659_v61 }
 0x2bd   :  { %1214 = vtanh.f32 %v803_v15 }
 0x2be   :  { %1216 = vtanh.f32 %v798_v14 }
 0x2bf   :  { %1218 = vtanh.f32 %v793_v17 }
 0x2c0   :  { %1220 = vtanh.f32 %v788_v18 }
 0x2c1   :  { %1222 = vtanh.f32 %v783_v20 }
 0x2c2   :  { %1224 = vtanh.f32 %v778_v21 }
 0x2c3   :  { %1226 = vtanh.f32 %v773_v22 }
 0x2c4   :  { %1228 = vtanh.f32 %v768_v24 }
 0x2c5   :  { %1230 = vtanh.f32 %v763_v27 }
 0x2c6   :  { %1232 = vtanh.f32 %v758_v29 }
 0x2c7   :  { %1234 = vtanh.f32 %v753_v32 }
 0x2c8   :  { %v1213_v25 = vpop.eup %1212  ;;  %1236 = vtanh.f32 %v748_v35 }
 0x2c9   :  { %1109 = vmatpush3.msra.mxu0 %v1213_v25  ;;  %1238 = vtanh.f32 %v743_v37 }
 0x2ca   :  { %v1215_v28 = vpop.eup %1214  ;;  %1110 = vmatprep.subr.mxu0 %v1245_v52  ;;  %1240 = vtanh.f32 %v738_v40 }
 0x2cb   :  { %1111 = vmatpush3.msra.mxu0 %v1215_v28  ;;  %v1217_v30 = vpop.eup %1216  ;;  %1242 = vtanh.f32 %v733_v43 }
 0x2cc   :  { %1112 = vmatprep.subr.mxu0 %v1245_v52  ;;  %v1219_v33 = vpop.eup %1218 }
 0x2cd   :  { %1113 = vmatpush3.msra.mxu0 %v1217_v30  ;;  %v1221_v36 = vpop.eup %1220 }
 0x2ce   :  { %1114 = vmatprep.subr.mxu0 %v1245_v52  ;;  %v1223_v38 = vpop.eup %1222 }
 0x2cf   :  { %1115 = vmatpush3.msra.mxu0 %v1219_v33  ;;  %v1225_v41 = vpop.eup %1224 }
 0x2d0   :  { %1116 = vmatprep.subr.mxu0 %v1245_v52  ;;  %v1227_v44 = vpop.eup %1226 }
 0x2d1   :  { %1117 = vmatpush3.msra.mxu0 %v1221_v36  ;;  %v1229_v45 = vpop.eup %1228 }
 0x2d2   :  { %1118 = vmatprep.subr.mxu0 %v1245_v52  ;;  %v1231_v46 = vpop.eup %1230 }
 0x2d3   :  { %1119 = vmatpush3.msra.mxu0 %v1223_v38  ;;  %v1233_v47 = vpop.eup %1232 }
 0x2d4   :  { %1120 = vmatprep.subr.mxu0 %v1245_v52  ;;  %v1235_v48 = vpop.eup %1234 }
 0x2d5   :  { %1121 = vmatpush3.msra.mxu0 %v1225_v41  ;;  %v1237_v49 = vpop.eup %1236 }
 0x2d6   :  { %1122 = vmatprep.subr.mxu0 %v1245_v52  ;;  %v1239_v50 = vpop.eup %1238 }
 0x2d7   :  { %1123 = vmatpush3.msra.mxu0 %v1227_v44  ;;  %v1241_v51 = vpop.eup %1240 }
 0x2d8   :  { %1124 = vmatprep.subr.mxu0 %v1245_v52  ;;  %v1243_v54 = vpop.eup %1242 }
 0x2d9   :  { %1125 = vmatpush3.msra.mxu0 %v1229_v45 }
 0x2da   :  { %1126 = vmatprep.subr.mxu0 %v1245_v52 }
 0x2db   :  { %1127 = vmatpush3.msra.mxu0 %v1231_v46 }
 0x2dc   :  { %1128 = vmatprep.subr.mxu0 %v1245_v52 }
 0x2dd   :  { %1129 = vmatpush3.msra.mxu0 %v1233_v47 }
 0x2de   :  { %1130 = vmatprep.subr.mxu0 %v1245_v52 }
 0x2df   :  { %1131 = vmatpush3.msra.mxu0 %v1235_v48 }
 0x2e0   :  { %1132 = vmatprep.subr.mxu0 %v1245_v52 }
 0x2e1   :  { %1133 = vmatpush3.msra.mxu0 %v1237_v49 }
 0x2e2   :  { %1134 = vmatprep.subr.mxu0 %v1245_v52 }
 0x2e3   :  { %1135 = vmatpush3.msra.mxu0 %v1239_v50 }
 0x2e4   :  { %1136 = vmatprep.subr.mxu0 %v1245_v52 }
 0x2e5   :  { %1137 = vmatpush3.msra.mxu0 %v1241_v51 }
 0x2e6   :  { %1138 = vmatprep.subr.mxu0 %v1245_v52 }
 0x2e7   :  { %1139 = vmatpush3.msra.mxu0 %v1243_v54 }
 0x2e8   :  { %1141 = vmatmul.mubr.f32.vlgmr.msra.gmra.mxu0 %v827_v53 }
 0x3a8   :  { %v904_v56 = vpop.f32.mrf.mxu0 }
 0x3a9   :  { %v905_v57 = vadd.f32 %v904_v56, %v836_v55 }
 0x3aa   :  { %v1142_v58 = vpop.f32.mrf.mxu0 }
 0x3ab   :  { %908 = vst [vmem:[%s1659_s9] sm:$0xff] %v905_v57 }

</bundles_post_ra>
